<compile_context>
chip_gen: v6e
topology: v6e:2x2x1
jax: 0.10.0
libtpu: 0.0.40
codegen_flags: <defaults>
</compile_context>

<pallas_src>
import math
import jax
import jax.numpy as jnp
from jax import lax
from jax.experimental import pallas as pl
from jax.experimental.pallas import tpu as pltpu

DIMS = 32
HEADS = 4
DH = DIMS // HEADS       # 8
SEQ = 8
BATCH = 2
TOK = BATCH * SEQ        # 16 tokens per tensor


def mha_kernel(x_ref, w_ref, b_ref, o_ref):
    """x_ref: (3*TOK, DIMS) = [key; value; query] stacked on sublanes.
       w_ref: (DIMS, 4*DIMS) = [Wk | Wv | Wq*scale | Wo] packed along lanes.
       b_ref: (1, 4*DIMS)    = [bk | bv | bq*scale | bo] packed along lanes.
       o_ref: (TOK, DIMS)."""
    # --- fused projections: one MXU push + one VPU bias add ---------------------------
    # proj[row-block r, lane-block c] = input_r @ W_c + b_c; only the diagonal pairs
    # (key,Wk), (value,Wv), (query,Wq*scale) are consumed below.
    proj = jnp.dot(x_ref[...], w_ref[...],
                   preferred_element_type=jnp.float32) + b_ref[...]          # (48, 128)

    wo = w_ref[:, 3 * DIMS:4 * DIMS]          # (DIMS, DIMS)
    bo = b_ref[:, 3 * DIMS:4 * DIMS]          # (1, DIMS)

    # --- per-(batch, head) attention scores, stacked for ONE softmax pass -------------
    scores = []
    for b in range(BATCH):
        for h in range(HEADS):
            qh = proj[2 * TOK + b * SEQ:2 * TOK + (b + 1) * SEQ,
                      2 * DIMS + h * DH:2 * DIMS + (h + 1) * DH]             # (L, dh), pre-scaled
            kh = proj[b * SEQ:(b + 1) * SEQ, h * DH:(h + 1) * DH]            # (L, dh)
            # Contract the last axes of q and k directly on the MXU (no transpose).
            scores.append(lax.dot_general(qh, kh, (((1,), (1,)), ((), ())),
                                          preferred_element_type=jnp.float32))  # (L, L)
    s = jnp.concatenate(scores, axis=0)                    # (B*H*L, L) = (64, 8), sublane stack
    s = s - jnp.max(s, axis=-1, keepdims=True)
    e = jnp.exp(s)
    attn = e / jnp.sum(e, axis=-1, keepdims=True)          # exact softmax(dim=-1)

    # --- context + output projection; head re-assembly folded into Wo row blocks ------
    outs = []
    for b in range(BATCH):
        acc = jnp.zeros((SEQ, DIMS), jnp.float32)
        for h in range(HEADS):
            idx = b * HEADS + h
            a = attn[idx * SEQ:(idx + 1) * SEQ, :]                           # (L, L) sublane slice
            vh = proj[TOK + b * SEQ:TOK + (b + 1) * SEQ,
                      DIMS + h * DH:DIMS + (h + 1) * DH]                     # (L, dh)
            ctx = jnp.dot(a, vh, preferred_element_type=jnp.float32)         # (L, dh)
            acc = acc + jnp.dot(ctx, wo[h * DH:(h + 1) * DH, :],
                                preferred_element_type=jnp.float32)          # (L, D)
        outs.append(acc + bo)
    o_ref[...] = jnp.concatenate(outs, axis=0)             # (TOK, DIMS), single full store


def multi_head_attention(key, value, query, params):
    """Matches MultiHeadAttention.forward(key, value, query, mask=None)."""
    B, L, D = key.shape
    assert (B, L, D) == (BATCH, SEQ, DIMS)

    # Stack the three activation tensors along sublanes -> one input DMA, one fused matmul.
    x = jnp.concatenate([key.reshape(B * L, D),
                         value.reshape(B * L, D),
                         query.reshape(B * L, D)], axis=0)                   # (48, 32)

    vmem = pl.BlockSpec(memory_space=pltpu.MemorySpace.VMEM)
    out_flat = pl.pallas_call(
        mha_kernel,
        out_shape=jax.ShapeDtypeStruct((B * L, D), jnp.float32),
        in_specs=[vmem, vmem, vmem],
        out_specs=vmem,
    )(x, params["w_packed"], params["b_packed"])

    return out_flat.reshape(B, L, D)


def reference_mha(key, value, query, params):
    """Pure-JAX reference mirroring the PyTorch forward (mask=None), f32-faithful matmuls."""
    B, L, D = key.shape
    hp = jax.lax.Precision.HIGHEST
    k = jnp.dot(key, params["wk"], precision=hp) + params["bk"]
    v = jnp.dot(value, params["wv"], precision=hp) + params["bv"]
    q = jnp.dot(query, params["wq"], precision=hp) + params["bq"]

    def split_heads(x):
        return x.reshape(B, L, HEADS, DH).transpose(0, 2, 1, 3)   # (B, H, L, dh)

    k, v, q = split_heads(k), split_heads(v), split_heads(q)
    q = q / math.sqrt(DH)
    scores = jnp.einsum("bhqd,bhkd->bhqk", q, k, precision=hp)
    attn = jax.nn.softmax(scores, axis=-1)
    ctx = jnp.einsum("bhqk,bhkd->bhqd", attn, v, precision=hp)
    ctx = ctx.transpose(0, 2, 1, 3).reshape(B, L, D)
    return jnp.dot(ctx, params["wo"], precision=hp) + params["bo"]


def init_params(rng):
    keys = jax.random.split(rng, 8)
    bound = 1.0 / math.sqrt(DIMS)

    def w(k):  # stored as (in, out) so x @ W + b == torch's x @ W.T + b
        return jax.random.uniform(k, (DIMS, DIMS), jnp.float32, -bound, bound)

    def b(k):
        return jax.random.uniform(k, (1, DIMS), jnp.float32, -bound, bound)

    p = {
        "wk": w(keys[0]), "bk": b(keys[1]),
        "wv": w(keys[2]), "bv": b(keys[3]),
        "wq": w(keys[4]), "bq": b(keys[5]),
        "wo": w(keys[6]), "bo": b(keys[7]),
    }
    # One-time packing for the kernel (review items 1 & 6): a single lane-dense weight strip
    # and bias row, with the 1/sqrt(dh) query scale folded into Wq / bq.
    scale = 1.0 / math.sqrt(DH)
    p["w_packed"] = jnp.concatenate(
        [p["wk"], p["wv"], p["wq"] * scale, p["wo"]], axis=1)                # (32, 128)
    p["b_packed"] = jnp.concatenate(
        [p["bk"], p["bv"], p["bq"] * scale, p["bo"]], axis=1)                # (1, 128)
    return p


if __name__ == "__main__":
    root = jax.random.PRNGKey(0)
    k_in, k_key, k_val, k_qry = jax.random.split(root, 4)

    params = init_params(k_in)
    key = jax.random.normal(k_key, (BATCH, SEQ, DIMS), jnp.float32)
    value = jax.random.normal(k_val, (BATCH, SEQ, DIMS), jnp.float32)
    query = jax.random.normal(k_qry, (BATCH, SEQ, DIMS), jnp.float32)

    out = multi_head_attention(key, value, query, params)
    out = jax.block_until_ready(out)

    ref = reference_mha(key, value, query, params)
    assert out.shape == (BATCH, SEQ, DIMS)
    # Exact softmax normalization now (no approx reciprocal); tolerance only needs to cover
    # MXU pass-precision / operation-ordering differences vs. the f32 XLA reference.
    assert jnp.allclose(out, ref, atol=2e-3, rtol=2e-3), "mismatch vs reference"

    print("KERNEL_OK")
</pallas_src>

<mosaic_0001>
module attributes {stable_mosaic.version = 11 : i64} {
  func.func @mha_kernel(%arg0: memref<48x32xf32, #tpu.memory_space<vmem>>, %arg1: memref<32x128xf32, #tpu.memory_space<vmem>>, %arg2: memref<1x128xf32, #tpu.memory_space<vmem>>, %arg3: memref<16x32xf32, #tpu.memory_space<vmem>>) attributes {dimension_semantics = [], scalar_prefetch = 0 : i64, scratch_operands = 0 : i64, tpu.core_type = #tpu.core_type<tc>} {
    %c0 = arith.constant 0 : index
    %c0_0 = arith.constant 0 : index
    %0 = vector.load %arg0[%c0, %c0_0] : memref<48x32xf32, #tpu.memory_space<vmem>>, vector<48x32xf32>
    %c0_1 = arith.constant 0 : index
    %c0_2 = arith.constant 0 : index
    %1 = vector.load %arg1[%c0_1, %c0_2] : memref<32x128xf32, #tpu.memory_space<vmem>>, vector<32x128xf32>
    %cst = arith.constant dense<0.000000e+00> : vector<48x128xf32>
    %2 = tpu.matmul %0, %1, %cst {dimension_numbers = #tpu.dot_dimension_numbers<[1], [0], [0], [1], [0, 0, 1, 1], [], []>} : vector<48x32xf32>, vector<32x128xf32>, vector<48x128xf32> -> vector<48x128xf32>
    %c0_3 = arith.constant 0 : index
    %c0_4 = arith.constant 0 : index
    %3 = vector.load %arg2[%c0_3, %c0_4] : memref<1x128xf32, #tpu.memory_space<vmem>>, vector<1x128xf32>
    %4 = vector.broadcast %3 : vector<1x128xf32> to vector<48x128xf32>
    %5 = arith.addf %2, %4 : vector<48x128xf32>
    %c0_5 = arith.constant 0 : index
    %c96 = arith.constant 96 : index
    %6 = vector.load %arg1[%c0_5, %c96] : memref<32x128xf32, #tpu.memory_space<vmem>>, vector<32x32xf32>
    %c0_6 = arith.constant 0 : index
    %c96_7 = arith.constant 96 : index
    %7 = vector.load %arg2[%c0_6, %c96_7] : memref<1x128xf32, #tpu.memory_space<vmem>>, vector<1x32xf32>
    %8 = vector.extract_strided_slice %5 {offsets = [32, 64], sizes = [8, 8], strides = [1, 1]} : vector<48x128xf32> to vector<8x8xf32>
    %9 = vector.extract_strided_slice %5 {offsets = [0, 0], sizes = [8, 8], strides = [1, 1]} : vector<48x128xf32> to vector<8x8xf32>
    %cst_8 = arith.constant dense<0.000000e+00> : vector<8x8xf32>
    %10 = tpu.matmul %8, %9, %cst_8 {dimension_numbers = #tpu.dot_dimension_numbers<[1], [1], [0], [0], [0, 0, 1, 0], [], []>} : vector<8x8xf32>, vector<8x8xf32>, vector<8x8xf32> -> vector<8x8xf32>
    %11 = vector.extract_strided_slice %5 {offsets = [32, 72], sizes = [8, 8], strides = [1, 1]} : vector<48x128xf32> to vector<8x8xf32>
    %12 = vector.extract_strided_slice %5 {offsets = [0, 8], sizes = [8, 8], strides = [1, 1]} : vector<48x128xf32> to vector<8x8xf32>
    %cst_9 = arith.constant dense<0.000000e+00> : vector<8x8xf32>
    %13 = tpu.matmul %11, %12, %cst_9 {dimension_numbers = #tpu.dot_dimension_numbers<[1], [1], [0], [0], [0, 0, 1, 0], [], []>} : vector<8x8xf32>, vector<8x8xf32>, vector<8x8xf32> -> vector<8x8xf32>
    %14 = vector.extract_strided_slice %5 {offsets = [32, 80], sizes = [8, 8], strides = [1, 1]} : vector<48x128xf32> to vector<8x8xf32>
    %15 = vector.extract_strided_slice %5 {offsets = [0, 16], sizes = [8, 8], strides = [1, 1]} : vector<48x128xf32> to vector<8x8xf32>
    %cst_10 = arith.constant dense<0.000000e+00> : vector<8x8xf32>
    %16 = tpu.matmul %14, %15, %cst_10 {dimension_numbers = #tpu.dot_dimension_numbers<[1], [1], [0], [0], [0, 0, 1, 0], [], []>} : vector<8x8xf32>, vector<8x8xf32>, vector<8x8xf32> -> vector<8x8xf32>
    %17 = vector.extract_strided_slice %5 {offsets = [32, 88], sizes = [8, 8], strides = [1, 1]} : vector<48x128xf32> to vector<8x8xf32>
    %18 = vector.extract_strided_slice %5 {offsets = [0, 24], sizes = [8, 8], strides = [1, 1]} : vector<48x128xf32> to vector<8x8xf32>
    %cst_11 = arith.constant dense<0.000000e+00> : vector<8x8xf32>
    %19 = tpu.matmul %17, %18, %cst_11 {dimension_numbers = #tpu.dot_dimension_numbers<[1], [1], [0], [0], [0, 0, 1, 0], [], []>} : vector<8x8xf32>, vector<8x8xf32>, vector<8x8xf32> -> vector<8x8xf32>
    %20 = vector.extract_strided_slice %5 {offsets = [40, 64], sizes = [8, 8], strides = [1, 1]} : vector<48x128xf32> to vector<8x8xf32>
    %21 = vector.extract_strided_slice %5 {offsets = [8, 0], sizes = [8, 8], strides = [1, 1]} : vector<48x128xf32> to vector<8x8xf32>
    %cst_12 = arith.constant dense<0.000000e+00> : vector<8x8xf32>
    %22 = tpu.matmul %20, %21, %cst_12 {dimension_numbers = #tpu.dot_dimension_numbers<[1], [1], [0], [0], [0, 0, 1, 0], [], []>} : vector<8x8xf32>, vector<8x8xf32>, vector<8x8xf32> -> vector<8x8xf32>
    %23 = vector.extract_strided_slice %5 {offsets = [40, 72], sizes = [8, 8], strides = [1, 1]} : vector<48x128xf32> to vector<8x8xf32>
    %24 = vector.extract_strided_slice %5 {offsets = [8, 8], sizes = [8, 8], strides = [1, 1]} : vector<48x128xf32> to vector<8x8xf32>
    %cst_13 = arith.constant dense<0.000000e+00> : vector<8x8xf32>
    %25 = tpu.matmul %23, %24, %cst_13 {dimension_numbers = #tpu.dot_dimension_numbers<[1], [1], [0], [0], [0, 0, 1, 0], [], []>} : vector<8x8xf32>, vector<8x8xf32>, vector<8x8xf32> -> vector<8x8xf32>
    %26 = vector.extract_strided_slice %5 {offsets = [40, 80], sizes = [8, 8], strides = [1, 1]} : vector<48x128xf32> to vector<8x8xf32>
    %27 = vector.extract_strided_slice %5 {offsets = [8, 16], sizes = [8, 8], strides = [1, 1]} : vector<48x128xf32> to vector<8x8xf32>
    %cst_14 = arith.constant dense<0.000000e+00> : vector<8x8xf32>
    %28 = tpu.matmul %26, %27, %cst_14 {dimension_numbers = #tpu.dot_dimension_numbers<[1], [1], [0], [0], [0, 0, 1, 0], [], []>} : vector<8x8xf32>, vector<8x8xf32>, vector<8x8xf32> -> vector<8x8xf32>
    %29 = vector.extract_strided_slice %5 {offsets = [40, 88], sizes = [8, 8], strides = [1, 1]} : vector<48x128xf32> to vector<8x8xf32>
    %30 = vector.extract_strided_slice %5 {offsets = [8, 24], sizes = [8, 8], strides = [1, 1]} : vector<48x128xf32> to vector<8x8xf32>
    %cst_15 = arith.constant dense<0.000000e+00> : vector<8x8xf32>
    %31 = tpu.matmul %29, %30, %cst_15 {dimension_numbers = #tpu.dot_dimension_numbers<[1], [1], [0], [0], [0, 0, 1, 0], [], []>} : vector<8x8xf32>, vector<8x8xf32>, vector<8x8xf32> -> vector<8x8xf32>
    %32 = tpu.concatenate %10, %13, %16, %19, %22, %25, %28, %31 in 0 : vector<8x8xf32>, vector<8x8xf32>, vector<8x8xf32>, vector<8x8xf32>, vector<8x8xf32>, vector<8x8xf32>, vector<8x8xf32>, vector<8x8xf32> -> vector<64x8xf32>
    %cst_16 = arith.constant dense<0xFF800000> : vector<64xf32>
    %33 = vector.multi_reduction <maximumf>, %32, %cst_16 [1] : vector<64x8xf32> to vector<64xf32>
    %34 = vector.shape_cast %33 : vector<64xf32> to vector<64x1xf32>
    %35 = vector.broadcast %34 : vector<64x1xf32> to vector<64x8xf32>
    %36 = arith.subf %32, %35 : vector<64x8xf32>
    %37 = math.exp %36 : vector<64x8xf32>
    %cst_17 = arith.constant dense<0.000000e+00> : vector<64xf32>
    %38 = vector.multi_reduction <add>, %37, %cst_17 [1] : vector<64x8xf32> to vector<64xf32>
    %39 = vector.shape_cast %38 : vector<64xf32> to vector<64x1xf32>
    %40 = vector.broadcast %39 : vector<64x1xf32> to vector<64x8xf32>
    %41 = arith.divf %37, %40 : vector<64x8xf32>
    %cst_18 = arith.constant 0.000000e+00 : f32
    %42 = vector.broadcast %cst_18 : f32 to vector<8x32xf32>
    %43 = vector.extract_strided_slice %41 {offsets = [0, 0], sizes = [8, 8], strides = [1, 1]} : vector<64x8xf32> to vector<8x8xf32>
    %44 = vector.extract_strided_slice %5 {offsets = [16, 32], sizes = [8, 8], strides = [1, 1]} : vector<48x128xf32> to vector<8x8xf32>
    %cst_19 = arith.constant dense<0.000000e+00> : vector<8x8xf32>
    %45 = tpu.matmul %43, %44, %cst_19 {dimension_numbers = #tpu.dot_dimension_numbers<[1], [0], [0], [1], [0, 0, 1, 1], [], []>} : vector<8x8xf32>, vector<8x8xf32>, vector<8x8xf32> -> vector<8x8xf32>
    %46 = vector.extract_strided_slice %6 {offsets = [0, 0], sizes = [8, 32], strides = [1, 1]} : vector<32x32xf32> to vector<8x32xf32>
    %cst_20 = arith.constant dense<0.000000e+00> : vector<8x32xf32>
    %47 = tpu.matmul %45, %46, %cst_20 {dimension_numbers = #tpu.dot_dimension_numbers<[1], [0], [0], [1], [0, 0, 1, 1], [], []>} : vector<8x8xf32>, vector<8x32xf32>, vector<8x32xf32> -> vector<8x32xf32>
    %48 = arith.addf %42, %47 : vector<8x32xf32>
    %49 = vector.extract_strided_slice %41 {offsets = [8, 0], sizes = [8, 8], strides = [1, 1]} : vector<64x8xf32> to vector<8x8xf32>
    %50 = vector.extract_strided_slice %5 {offsets = [16, 40], sizes = [8, 8], strides = [1, 1]} : vector<48x128xf32> to vector<8x8xf32>
    %cst_21 = arith.constant dense<0.000000e+00> : vector<8x8xf32>
    %51 = tpu.matmul %49, %50, %cst_21 {dimension_numbers = #tpu.dot_dimension_numbers<[1], [0], [0], [1], [0, 0, 1, 1], [], []>} : vector<8x8xf32>, vector<8x8xf32>, vector<8x8xf32> -> vector<8x8xf32>
    %52 = vector.extract_strided_slice %6 {offsets = [8, 0], sizes = [8, 32], strides = [1, 1]} : vector<32x32xf32> to vector<8x32xf32>
    %cst_22 = arith.constant dense<0.000000e+00> : vector<8x32xf32>
    %53 = tpu.matmul %51, %52, %cst_22 {dimension_numbers = #tpu.dot_dimension_numbers<[1], [0], [0], [1], [0, 0, 1, 1], [], []>} : vector<8x8xf32>, vector<8x32xf32>, vector<8x32xf32> -> vector<8x32xf32>
    %54 = arith.addf %48, %53 : vector<8x32xf32>
    %55 = vector.extract_strided_slice %41 {offsets = [16, 0], sizes = [8, 8], strides = [1, 1]} : vector<64x8xf32> to vector<8x8xf32>
    %56 = vector.extract_strided_slice %5 {offsets = [16, 48], sizes = [8, 8], strides = [1, 1]} : vector<48x128xf32> to vector<8x8xf32>
    %cst_23 = arith.constant dense<0.000000e+00> : vector<8x8xf32>
    %57 = tpu.matmul %55, %56, %cst_23 {dimension_numbers = #tpu.dot_dimension_numbers<[1], [0], [0], [1], [0, 0, 1, 1], [], []>} : vector<8x8xf32>, vector<8x8xf32>, vector<8x8xf32> -> vector<8x8xf32>
    %58 = vector.extract_strided_slice %6 {offsets = [16, 0], sizes = [8, 32], strides = [1, 1]} : vector<32x32xf32> to vector<8x32xf32>
    %cst_24 = arith.constant dense<0.000000e+00> : vector<8x32xf32>
    %59 = tpu.matmul %57, %58, %cst_24 {dimension_numbers = #tpu.dot_dimension_numbers<[1], [0], [0], [1], [0, 0, 1, 1], [], []>} : vector<8x8xf32>, vector<8x32xf32>, vector<8x32xf32> -> vector<8x32xf32>
    %60 = arith.addf %54, %59 : vector<8x32xf32>
    %61 = vector.extract_strided_slice %41 {offsets = [24, 0], sizes = [8, 8], strides = [1, 1]} : vector<64x8xf32> to vector<8x8xf32>
    %62 = vector.extract_strided_slice %5 {offsets = [16, 56], sizes = [8, 8], strides = [1, 1]} : vector<48x128xf32> to vector<8x8xf32>
    %cst_25 = arith.constant dense<0.000000e+00> : vector<8x8xf32>
    %63 = tpu.matmul %61, %62, %cst_25 {dimension_numbers = #tpu.dot_dimension_numbers<[1], [0], [0], [1], [0, 0, 1, 1], [], []>} : vector<8x8xf32>, vector<8x8xf32>, vector<8x8xf32> -> vector<8x8xf32>
    %64 = vector.extract_strided_slice %6 {offsets = [24, 0], sizes = [8, 32], strides = [1, 1]} : vector<32x32xf32> to vector<8x32xf32>
    %cst_26 = arith.constant dense<0.000000e+00> : vector<8x32xf32>
    %65 = tpu.matmul %63, %64, %cst_26 {dimension_numbers = #tpu.dot_dimension_numbers<[1], [0], [0], [1], [0, 0, 1, 1], [], []>} : vector<8x8xf32>, vector<8x32xf32>, vector<8x32xf32> -> vector<8x32xf32>
    %66 = arith.addf %60, %65 : vector<8x32xf32>
    %67 = vector.broadcast %7 : vector<1x32xf32> to vector<8x32xf32>
    %68 = arith.addf %66, %67 : vector<8x32xf32>
    %cst_27 = arith.constant 0.000000e+00 : f32
    %69 = vector.broadcast %cst_27 : f32 to vector<8x32xf32>
    %70 = vector.extract_strided_slice %41 {offsets = [32, 0], sizes = [8, 8], strides = [1, 1]} : vector<64x8xf32> to vector<8x8xf32>
    %71 = vector.extract_strided_slice %5 {offsets = [24, 32], sizes = [8, 8], strides = [1, 1]} : vector<48x128xf32> to vector<8x8xf32>
    %cst_28 = arith.constant dense<0.000000e+00> : vector<8x8xf32>
    %72 = tpu.matmul %70, %71, %cst_28 {dimension_numbers = #tpu.dot_dimension_numbers<[1], [0], [0], [1], [0, 0, 1, 1], [], []>} : vector<8x8xf32>, vector<8x8xf32>, vector<8x8xf32> -> vector<8x8xf32>
    %73 = vector.extract_strided_slice %6 {offsets = [0, 0], sizes = [8, 32], strides = [1, 1]} : vector<32x32xf32> to vector<8x32xf32>
    %cst_29 = arith.constant dense<0.000000e+00> : vector<8x32xf32>
    %74 = tpu.matmul %72, %73, %cst_29 {dimension_numbers = #tpu.dot_dimension_numbers<[1], [0], [0], [1], [0, 0, 1, 1], [], []>} : vector<8x8xf32>, vector<8x32xf32>, vector<8x32xf32> -> vector<8x32xf32>
    %75 = arith.addf %69, %74 : vector<8x32xf32>
    %76 = vector.extract_strided_slice %41 {offsets = [40, 0], sizes = [8, 8], strides = [1, 1]} : vector<64x8xf32> to vector<8x8xf32>
    %77 = vector.extract_strided_slice %5 {offsets = [24, 40], sizes = [8, 8], strides = [1, 1]} : vector<48x128xf32> to vector<8x8xf32>
    %cst_30 = arith.constant dense<0.000000e+00> : vector<8x8xf32>
    %78 = tpu.matmul %76, %77, %cst_30 {dimension_numbers = #tpu.dot_dimension_numbers<[1], [0], [0], [1], [0, 0, 1, 1], [], []>} : vector<8x8xf32>, vector<8x8xf32>, vector<8x8xf32> -> vector<8x8xf32>
    %79 = vector.extract_strided_slice %6 {offsets = [8, 0], sizes = [8, 32], strides = [1, 1]} : vector<32x32xf32> to vector<8x32xf32>
    %cst_31 = arith.constant dense<0.000000e+00> : vector<8x32xf32>
    %80 = tpu.matmul %78, %79, %cst_31 {dimension_numbers = #tpu.dot_dimension_numbers<[1], [0], [0], [1], [0, 0, 1, 1], [], []>} : vector<8x8xf32>, vector<8x32xf32>, vector<8x32xf32> -> vector<8x32xf32>
    %81 = arith.addf %75, %80 : vector<8x32xf32>
    %82 = vector.extract_strided_slice %41 {offsets = [48, 0], sizes = [8, 8], strides = [1, 1]} : vector<64x8xf32> to vector<8x8xf32>
    %83 = vector.extract_strided_slice %5 {offsets = [24, 48], sizes = [8, 8], strides = [1, 1]} : vector<48x128xf32> to vector<8x8xf32>
    %cst_32 = arith.constant dense<0.000000e+00> : vector<8x8xf32>
    %84 = tpu.matmul %82, %83, %cst_32 {dimension_numbers = #tpu.dot_dimension_numbers<[1], [0], [0], [1], [0, 0, 1, 1], [], []>} : vector<8x8xf32>, vector<8x8xf32>, vector<8x8xf32> -> vector<8x8xf32>
    %85 = vector.extract_strided_slice %6 {offsets = [16, 0], sizes = [8, 32], strides = [1, 1]} : vector<32x32xf32> to vector<8x32xf32>
    %cst_33 = arith.constant dense<0.000000e+00> : vector<8x32xf32>
    %86 = tpu.matmul %84, %85, %cst_33 {dimension_numbers = #tpu.dot_dimension_numbers<[1], [0], [0], [1], [0, 0, 1, 1], [], []>} : vector<8x8xf32>, vector<8x32xf32>, vector<8x32xf32> -> vector<8x32xf32>
    %87 = arith.addf %81, %86 : vector<8x32xf32>
    %88 = vector.extract_strided_slice %41 {offsets = [56, 0], sizes = [8, 8], strides = [1, 1]} : vector<64x8xf32> to vector<8x8xf32>
    %89 = vector.extract_strided_slice %5 {offsets = [24, 56], sizes = [8, 8], strides = [1, 1]} : vector<48x128xf32> to vector<8x8xf32>
    %cst_34 = arith.constant dense<0.000000e+00> : vector<8x8xf32>
    %90 = tpu.matmul %88, %89, %cst_34 {dimension_numbers = #tpu.dot_dimension_numbers<[1], [0], [0], [1], [0, 0, 1, 1], [], []>} : vector<8x8xf32>, vector<8x8xf32>, vector<8x8xf32> -> vector<8x8xf32>
    %91 = vector.extract_strided_slice %6 {offsets = [24, 0], sizes = [8, 32], strides = [1, 1]} : vector<32x32xf32> to vector<8x32xf32>
    %cst_35 = arith.constant dense<0.000000e+00> : vector<8x32xf32>
    %92 = tpu.matmul %90, %91, %cst_35 {dimension_numbers = #tpu.dot_dimension_numbers<[1], [0], [0], [1], [0, 0, 1, 1], [], []>} : vector<8x8xf32>, vector<8x32xf32>, vector<8x32xf32> -> vector<8x32xf32>
    %93 = arith.addf %87, %92 : vector<8x32xf32>
    %94 = vector.broadcast %7 : vector<1x32xf32> to vector<8x32xf32>
    %95 = arith.addf %93, %94 : vector<8x32xf32>
    %96 = tpu.concatenate %68, %95 in 0 : vector<8x32xf32>, vector<8x32xf32> -> vector<16x32xf32>
    %c0_36 = arith.constant 0 : index
    %c0_37 = arith.constant 0 : index
    %97 = vector.load %arg3[%c0_36, %c0_37] : memref<16x32xf32, #tpu.memory_space<vmem>>, vector<16x32xf32>
    tpu.vector_store %arg3[%c0_36, %c0_37], %96 {strides = array<i32>} : memref<16x32xf32, #tpu.memory_space<vmem>>, vector<16x32xf32>,
    return
  }
}

</mosaic_0001>

<bundles_post_ra>
// kernel: tpu_custom_call.1
= control target key start
LH: loop header
LB: loop body
LE: loop exit
PB: predicated region body
PF: predicated region fallthrough
CT: control target
= control target key end

     0   :  { %vm32_vm0 = vcmask 261120   ;;  %s2717_s0 = inlined_call_operand.vmem [shape: f32[48,32], index: 0, kind: input, shape index: {}]   ;;  %s2718_s1 = inlined_call_operand.vmem [shape: f32[32,128], index: 1, kind: input, shape index: {}]   ;;  %s2719_s2 = inlined_call_operand.vmem [shape: f32[1,128], index: 2, kind: input, shape index: {}]   ;;  %s2720_s3 = inlined_call_operand.hbm [shape: f32[16,32], index: 3, kind: output, shape index: {}]  }
   0x1   :  { %v2441_v0 = vld [vmem:[%s2718_s1 + $0x18] sm:$0xff]  ;;  %v2446_v1 = vld [vmem:[%s2718_s1 + $0x10] sm:$0xff]  ;;  %v15_v2 = vld [vmem:[%s2717_s0] sm:$0xff] }
   0x2   :  { %2193 = vmatprep.subr.mxu0 %v2441_v0  ;;  %v2456_v3 = vld [vmem:[%s2718_s1 + $0x8] sm:$0xff]  ;;  %2201 = vmatprep.mubr.msk.f32.mxu0 %vm32_vm0, %v15_v2 }
   0x3   :  { %2194 = vmatpush3.msra.mxu0 %v2441_v0 }
   0x4   :  { %2195 = vmatprep.subr.mxu0 %v2446_v1 }
   0x5   :  { %8 = vsyncpa [#allocation3], 0  ;;  %2196 = vmatpush3.msra.mxu0 %v2446_v1  ;;  %v2464_v4 = vld [vmem:[%s2718_s1] sm:$0xff]  ;;  %v16_v5 = vld [vmem:[%s2717_s0 + $0x8] sm:$0xff]  ;;  %v2401_v10 = vmov 0.0   ;;  %vm2402_vm1 = vmmov 0  }
   0x6   :  { %2197 = vmatprep.subr.mxu0 %v2456_v3  ;;  %v17_v6 = vld [vmem:[%s2717_s0 + $0x10] sm:$0xff]  ;;  %v18_v7 = vld [vmem:[%s2717_s0 + $0x18] sm:$0xff]  ;;  %v19_v8 = vld [vmem:[%s2717_s0 + $0x20] sm:$0xff]  ;;  %2210 = vmatprep.subr.mxu1 %v2401_v10  ;;  %vm149_vm2 = vcmask 64512   ;;  %s2405_s6 = smov 112   ;;  %s2406_s7 = smov 120  }
   0x7   :  { %2198 = vmatpush3.msra.mxu0 %v2456_v3  ;;  %v20_v9 = vld [vmem:[%s2717_s0 + $0x28] sm:$0xff]  ;;  %2212 = vmatprep.mubr.msk.f32.mxu1 %vm2402_vm1, %v2401_v10  ;;  %v2499_v11 = vld [vmem:[%s2719_s2] ss:$0 sm:$0xff]  ;;  %s2403_s0 = smov 56   ;;  %s2404_s2 = smov 64  }
   0x8   :  { %2199 = vmatprep.subr.mxu0 %v2464_v4  ;;  %s2407_s8 = smov 104   ;;  %s2408_s9 = smov 48  }
   0x9   :  { %2200 = vmatpush3.msra.mxu0 %v2464_v4  ;;  %s2409_s10 = smov 40   ;;  %s2410_s11 = smov 88  }
   0xa   :  { %2202 = vmatmul.mubr.msk.f32.vlgmr.msra.gmra.mxu0 %vm32_vm0, %v16_v5  ;;  %2230 = vmatprep.subr.mxu0 %v2401_v10  ;;  %s2411_s12 = smov 96   ;;  %s2412_s13 = smov 80  }
   0xb   :  { %2204 = vmatprep.mubr.msk.f32.mxu0 %vm32_vm0, %v17_v6  ;;  %s2413_s14 = smov 32   ;;  %s2414_s15 = smov 72  }
   0xc   :  { %s2415_s16 = smov [#allocation2]  }
   0xd   :  { %s2085_s17 = sshll.u32 %s2415_s16, 4  ;;  %s2086_s17 = int_to_ptr.vmem [resolvable:$true] %s2085_s17 }
   0xe   :  { %2205 = vmatmul.mubr.msk.f32.gmra.mxu0 %vm32_vm0, %v18_v7  ;;  %s2379_s18 = scalar_lea.vmem %s2086_s17, 256  ;;  %p2384_p1 = scmp.lt.s32.totalorder %s2086_s17, %s2086_s17 }
   0xf   :  { %2207 = vmatprep.mubr.msk.f32.mxu0 %vm32_vm0, %v19_v8  ;;  %p2380_p0 = scmp.ne.s32.totalorder %s2086_s17, %s2379_s18  ;;  %p2385_p2 = scmp.lt.s32.totalorder %s2379_s18, %s2379_s18 }
  0x11   :  { %p2386_p3 = por %p2385_p2, %p2384_p1 }
  0x12   :  { %2208 = vmatmul.mubr.msk.f32.gmra.mxu0 %vm32_vm0, %v20_v9 }
  0x13   :  { %2232 = vmatprep.mubr.msk.f32.mxu0 %vm2402_vm1, %v2401_v10  ;;  %p2387_p4 = pnand %p2386_p3, %p2380_p0 }
  0xca   :  { %v2203_v12 = vpop.f32.mrf.mxu0 }
  0xcb   :  { %v2502_v13 = vadd.f32 %v2203_v12, %v2499_v11 }
  0xcc   :  { %v117_v14 = vpop.f32.mrf.mxu0 }
  0xcd   :  { %v118_v15 = vadd.f32 %v2499_v11, %v117_v14  ;;  %2231 = vmatpush3.xpose.msk.msra.mxu0 %vm149_vm2, %v2502_v13 }
  0xce   :  { %v2507_v16 = vpop.f32.mrf.mxu0  ;;  %2240 = vmatprep.subr.mxu0 %v2401_v10 }
  0xcf   :  { %2211 = vmatpush3.xpose.msk.msra.mxu1 %vm149_vm2, %v118_v15 }
  0xd0   :  { %v127_v17 = vpop.f32.mrf.mxu0  ;;  %2215 = vmatprep.subr.mxu1 %v2401_v10 }
  0xd1   :  { %v2550_v39 = vadd.f32 %v2499_v11, %v127_v17 }
  0xd2   :  { %v2209_v18 = vpop.f32.mrf.mxu0 }
  0xd3   :  { %v143_v38 = vadd.f32 %v2209_v18, %v2499_v11 }
  0xd4   :  { %v137_v19 = vpop.f32.mrf.mxu0 }
  0xd5   :  { %v138_v20 = vadd.f32 %v2499_v11, %v137_v19 }
  0xd7   :  { %225 = vrot.lane.b32.xlu1 %v138_v20, %s2403_s0  ;;  %147 = vrot.lane.b32.xlu0 %v138_v20, %s2404_s2 }
  0xdb   :  { %305 = vrot.lane.b32.xlu1 %v118_v15, %s2405_s6  ;;  %227 = vrot.lane.b32.xlu0 %v118_v15, %s2406_s7 }
  0xdf   :  { %383 = vrot.lane.b32.xlu1 %v118_v15, %s2407_s8  ;;  %303 = vrot.lane.b32.xlu0 %v138_v20, %s2408_s9 }
  0xe3   :  { %381 = vrot.lane.b32.xlu0 %v138_v20, %s2409_s10 }
  0xe7   :  { %539 = vrot.lane.b32.xlu0 %v2502_v13, %s2406_s7 }
 0x149   :  { %v226_v21 = vpop.permute.xlu1 %225  ;;  %v148_v22 = vpop.permute.xlu0 %147 }
 0x14a   :  { %2213 = vmatmul.mubr.msk.f32.vlgmr.msra.gmra.mxu1 %vm149_vm2, %v148_v22 }
 0x14b   :  { %2217 = vmatprep.mubr.msk.f32.mxu1 %vm2402_vm1, %v2401_v10 }
 0x14d   :  { %v228_v23 = vpop.permute.xlu0 %227  ;;  %v306_v24 = vpop.permute.xlu1 %305 }
 0x14e   :  { %2216 = vmatpush3.xpose.msk.msra.mxu1 %vm149_vm2, %v228_v23 }
 0x14f   :  { %2220 = vmatprep.subr.mxu1 %v2401_v10 }
 0x151   :  { %v304_v25 = vpop.permute.xlu0 %303  ;;  %2218 = vmatmul.mubr.msk.f32.vlgmr.msra.gmra.mxu1 %vm149_vm2, %v226_v21  ;;  %v384_v26 = vpop.permute.xlu1 %383 }
 0x152   :  { %2221 = vmatpush3.xpose.msk.msra.mxu1 %vm149_vm2, %v306_v24  ;;  %2222 = vmatprep.mubr.msk.f32.mxu1 %vm2402_vm1, %v2401_v10 }
 0x153   :  { %2225 = vmatprep.subr.mxu1 %v2401_v10 }
 0x155   :  { %v382_v27 = vpop.permute.xlu0 %381  ;;  %2223 = vmatmul.mubr.msk.f32.vlgmr.msra.gmra.mxu1 %vm149_vm2, %v304_v25 }
 0x156   :  { %2226 = vmatpush3.xpose.msk.msra.mxu1 %vm149_vm2, %v384_v26  ;;  %2227 = vmatprep.mubr.msk.f32.mxu1 %vm2402_vm1, %v2401_v10 }
 0x157   :  { %2235 = vmatprep.subr.mxu1 %v2401_v10 }
 0x159   :  { %v540_v28 = vpop.permute.xlu0 %539  ;;  %2228 = vmatmul.mubr.msk.f32.vlgmr.msra.gmra.mxu1 %vm149_vm2, %v382_v27 }
 0x15a   :  { %2236 = vmatpush3.xpose.msk.msra.mxu1 %vm149_vm2, %v540_v28  ;;  %2237 = vmatprep.mubr.msk.f32.mxu1 %vm2402_vm1, %v2401_v10 }
 0x15b   :  { %2245 = vmatprep.subr.mxu1 %v2401_v10 }
 0x20a   :  { %v2540_v29 = vpop.f32.mrf.mxu1 }
 0x20b   :  { %v771_v53 = vsel %vm149_vm2, %v2540_v29, -inf }
 0x20c   :  { %v2214_v30 = vpop.f32.mrf.mxu1 }
 0x211   :  { %v299_v31 = vpop.f32.mrf.mxu1 }
 0x212   :  { %v774_v32 = vsel %vm149_vm2, %v299_v31, -inf }
 0x213   :  { %775 = vmax.xlane.f32.xlu1 %v774_v32  ;;  %v2219_v33 = vpop.f32.mrf.mxu1 }
 0x215   :  { %v377_v34 = vpop.f32.mrf.mxu1 }
 0x216   :  { %v777_v40 = vsel %vm149_vm2, %v377_v34, -inf }
 0x217   :  { %v2224_v35 = vpop.f32.mrf.mxu1 }
 0x219   :  { %v2543_v36 = vpop.f32.mrf.mxu1 }
 0x21a   :  { %v780_v54 = vsel %vm149_vm2, %v2543_v36, -inf }
 0x21b   :  { %v2229_v37 = vpop.f32.mrf.mxu1 }
 0x224   :  { %537 = vrot.lane.b32.xlu1 %v143_v38, %s2403_s0 }
 0x228   :  { %695 = vrot.lane.b32.xlu1 %v2502_v13, %s2407_s8 }
 0x22c   :  { %936 = vrot.lane.b32.xlu1 %v2550_v39, %s2410_s11 }
 0x250   :  { %778 = vmax.xlane.f32.xlu1 %v777_v40 }
 0x261   :  { %460 = vrot.lane.b32.xlu1 %v143_v38, %s2404_s2 }
 0x265   :  { %615 = vrot.lane.b32.xlu1 %v143_v38, %s2408_s9 }
 0x269   :  { %860 = vrot.lane.b32.xlu1 %v2550_v39, %s2411_s12 }
 0x29c   :  { %v776_v41 = vpop.xlane.xlu1 %775 }
 0x29d   :  { %v796_v42 = vsub.f32 %v299_v31, %v776_v41  ;;  %v2618_v31 = vadd.f32 %v2507_v16, %v2499_v11 }
 0x29f   :  { %v805_v43 = vmul.f32 1.442695, %v796_v42 }
 0x2a0   :  { %v538_v44 = vpop.permute.xlu1 %537 }
 0x2a1   :  { %2347 = vpow2.f32 %v805_v43  ;;  %2238 = vmatmul.mubr.msk.f32.vlgmr.msra.gmra.mxu1 %vm149_vm2, %v538_v44 }
 0x2a2   :  { %2247 = vmatprep.mubr.msk.f32.mxu1 %vm2402_vm1, %v2401_v10 }
 0x2a4   :  { %v696_v45 = vpop.permute.xlu1 %695 }
 0x2a5   :  { %2246 = vmatpush3.xpose.msk.msra.mxu1 %vm149_vm2, %v696_v45 }
 0x2a6   :  { %2255 = vmatprep.subr.mxu1 %v2401_v10 }
 0x2a8   :  { %v937_v48 = vpop.permute.xlu1 %936 }
 0x2ae   :  { %v2348_v46 = vpop.eup %2347 }
 0x2af   :  { %v822_v47 = vsel %vm149_vm2, %v2348_v46, 0.0 }
 0x2b0   :  { %823 = vadd.xlane.f32.xlu0 %v822_v47 }
 0x2c6   :  { %693 = vrot.lane.b32.xlu0 %v143_v38, %s2409_s10 }
 0x2d9   :  { %v779_v49 = vpop.xlane.xlu1 %778 }
 0x2da   :  { %v797_v50 = vsub.f32 %v377_v34, %v779_v49 }
 0x2dc   :  { %v807_v51 = vmul.f32 1.442695, %v797_v50 }
 0x2dd   :  { %v461_v52 = vpop.permute.xlu1 %460 }
 0x2de   :  { %2349 = vpow2.f32 %v807_v51  ;;  %2233 = vmatmul.mubr.msk.f32.vlgmr.msra.gmra.mxu0 %vm149_vm2, %v461_v52 }
 0x2df   :  { %2242 = vmatprep.mubr.msk.f32.mxu0 %vm2402_vm1, %v2401_v10 }
 0x2e5   :  { %772 = vmax.xlane.f32.xlu0 %v771_v53 }
 0x2e9   :  { %781 = vmax.xlane.f32.xlu0 %v780_v54 }
 0x2eb   :  { %v2573_v55 = vpop.eup %2349 }
 0x2ec   :  { %v825_v56 = vsel %vm149_vm2, %v2573_v55, 0.0 }
 0x2ed   :  { %826 = vadd.xlane.f32.xlu1 %v825_v56 }
 0x2fe   :  { %1166 = vrot.lane.b32.xlu1 %v2550_v39, %s2412_s13 }
 0x339   :  { %v824_v57 = vpop.xlane.xlu0 %823 }
 0x33a   :  { %2351 = vrcp.f32 %v824_v57 }
 0x33d   :  { %v694_v58 = vpop.permute.xlu0 %693 }
 0x33e   :  { %2248 = vmatmul.mubr.msk.f32.vlgmr.msra.gmra.mxu1 %vm149_vm2, %v694_v58 }
 0x33f   :  { %2256 = vmatpush3.msra.mxu1 %v937_v48  ;;  %2257 = vmatprep.mubr.msk.f32.mxu1 %vm2402_vm1, %v2401_v10 }
 0x340   :  { %2265 = vmatprep.subr.mxu1 %v2401_v10 }
 0x347   :  { %v2352_v59 = vpop.eup %2351 }
 0x348   :  { %v846_v60 = vmul.f32 %v2352_v59, %v2348_v46 }
 0x34a   :  { %2258 = vmatmul.mubr.msk.f32.vlgmr.msra.gmra.mxu1 %vm149_vm2, %v846_v60 }
 0x34b   :  { %2267 = vmatprep.mubr.msk.f32.mxu1 %vm2402_vm1, %v2401_v10 }
 0x361   :  { %v611_v61 = vpop.f32.mrf.mxu1 }
 0x362   :  { %v786_v62 = vsel %vm149_vm2, %v611_v61, -inf }
 0x363   :  { %787 = vmax.xlane.f32.xlu1 %v786_v62  ;;  %v2239_v63 = vpop.f32.mrf.mxu1 }
 0x36e   :  { %v773_v2 = vpop.xlane.xlu0 %772 }
 0x36f   :  { %v795_v5 = vsub.f32 %v2540_v29, %v773_v2 }
 0x371   :  { %v803_v6 = vmul.f32 1.442695, %v795_v5 }
 0x372   :  { %v782_v12 = vpop.xlane.xlu0 %781 }
 0x373   :  { %2353 = vpow2.f32 %v803_v6 }
 0x374   :  { %1243 = vrot.lane.b32.xlu1 %v2446_v1, %s2413_s14  ;;  %v798_v1 = vsub.f32 %v2543_v36, %v782_v12 }
 0x376   :  { %v809_v17 = vmul.f32 1.442695, %v798_v1 }
 0x378   :  { %1397 = vrot.lane.b32.xlu1 %v2441_v0, %s2413_s14  ;;  %2355 = vpow2.f32 %v809_v17 }
 0x380   :  { %v2354_v7 = vpop.eup %2353 }
 0x381   :  { %v819_v8 = vsel %vm149_vm2, %v2354_v7, 0.0 }
 0x382   :  { %820 = vadd.xlane.f32.xlu0 %v819_v8 }
 0x385   :  { %v2599_v0 = vpop.eup %2355 }
 0x386   :  { %v828_v18 = vsel %vm149_vm2, %v2599_v0, 0.0 }
 0x398   :  { %617 = vrot.lane.b32.xlu0 %v2502_v13, %s2405_s6 }
 0x39c   :  { %1013 = vrot.lane.b32.xlu0 %v2456_v3, %s2413_s14  ;;  %v616_v3 = vpop.permute.xlu1 %615 }
 0x39e   :  { %v533_v9 = vpop.f32.mrf.mxu0 }
 0x39f   :  { %v783_v14 = vsel %vm149_vm2, %v533_v9, -inf }
 0x3a0   :  { %v2234_v15 = vpop.f32.mrf.mxu0  ;;  %784 = vmax.xlane.f32.xlu1 %v783_v14  ;;  %v861_v13 = vpop.permute.xlu1 %860 }
 0x3a4   :  { %v827_v19 = vpop.xlane.xlu1 %826 }
 0x3a8   :  { %v1167_v20 = vpop.permute.xlu1 %1166 }
 0x3bb   :  { %829 = vadd.xlane.f32.xlu0 %v828_v18 }
 0x3d1   :  { %1320 = vrot.lane.b32.xlu0 %v2550_v39, %s2414_s15 }
 0x3d5   :  { %1090 = vrot.lane.b32.xlu0 %v2464_v4, %s2413_s14 }
 0x3ec   :  { %v788_v21 = vpop.xlane.xlu1 %787 }
 0x3ed   :  { %v800_v22 = vsub.f32 %v611_v61, %v788_v21 }
 0x3ef   :  { %v813_v23 = vmul.f32 1.442695, %v800_v22 }
 0x3f0   :  { %v2631_v16 = vpop.permute.xlu1 %1243 }
 0x3f1   :  { %2357 = vpow2.f32 %v813_v23 }
 0x3f4   :  { %v2639_v37 = vpop.permute.xlu1 %1397 }
 0x3fe   :  { %v2607_v24 = vpop.eup %2357  ;;  %v2609_v25 = vpop.f32.mrf.mxu1 }
 0x3ff   :  { %v834_v26 = vsel %vm149_vm2, %v2607_v24, 0.0  ;;  %v792_v51 = vsel %vm149_vm2, %v2609_v25, -inf }
 0x400   :  { %835 = vadd.xlane.f32.xlu0 %v834_v26  ;;  %v2249_v27 = vpop.f32.mrf.mxu1 }
 0x40a   :  { %v1008_v28 = vpop.f32.mrf.mxu1 }
 0x40b   :  { %v821_v29 = vpop.xlane.xlu0 %820 }
 0x40c   :  { %2359 = vrcp.f32 %v821_v29  ;;  %v2259_v4 = vpop.f32.mrf.mxu1 }
 0x40d   :  { %2361 = vrcp.f32 %v827_v19 }
 0x40f   :  { %v618_v30 = vpop.permute.xlu0 %617 }
 0x410   :  { %2241 = vmatpush3.xpose.msk.msra.mxu0 %vm149_vm2, %v618_v30 }
 0x411   :  { %2250 = vmatprep.subr.mxu0 %v2401_v10 }
 0x413   :  { %2243 = vmatmul.mubr.msk.f32.vlgmr.msra.gmra.mxu0 %vm149_vm2, %v616_v3  ;;  %v2625_v34 = vpop.permute.xlu0 %1013 }
 0x414   :  { %2251 = vmatpush3.msra.mxu0 %v861_v13  ;;  %2252 = vmatprep.mubr.msk.f32.mxu0 %vm2402_vm1, %v2401_v10 }
 0x415   :  { %2260 = vmatprep.subr.mxu0 %v2401_v10 }
 0x416   :  { %1555 = vrot.lane.b32.xlu0 %v2618_v31, %s2410_s11 }
 0x419   :  { %v2360_v32 = vpop.eup %2359 }
 0x41a   :  { %v844_v33 = vmul.f32 %v2360_v32, %v2354_v7  ;;  %v2362_v35 = vpop.eup %2361 }
 0x41b   :  { %v848_v36 = vmul.f32 %v2362_v35, %v2573_v55 }
 0x41c   :  { %2253 = vmatmul.mubr.msk.f32.vlgmr.msra.gmra.mxu0 %vm149_vm2, %v844_v33 }
 0x41d   :  { %2261 = vmatpush3.msra.mxu0 %v2625_v34  ;;  %2262 = vmatprep.mubr.msk.f32.mxu0 %vm2402_vm1, %v2401_v10 }
 0x41e   :  { %2270 = vmatprep.subr.mxu0 %v2401_v10 }
 0x420   :  { %2263 = vmatmul.mubr.msk.f32.vlgmr.msra.gmra.mxu0 %vm149_vm2, %v1008_v28 }
 0x421   :  { %2271 = vmatpush3.msra.mxu0 %v1167_v20  ;;  %2272 = vmatprep.mubr.msk.f32.mxu0 %vm2402_vm1, %v2401_v10 }
 0x422   :  { %2280 = vmatprep.subr.mxu0 %v2401_v10 }
 0x424   :  { %2273 = vmatmul.mubr.msk.f32.vlgmr.msra.gmra.mxu0 %vm149_vm2, %v848_v36 }
 0x425   :  { %2282 = vmatprep.mubr.msk.f32.mxu0 %vm2402_vm1, %v2401_v10 }
 0x429   :  { %v785_v38 = vpop.xlane.xlu1 %784 }
 0x42a   :  { %v799_v39 = vsub.f32 %v533_v9, %v785_v38 }
 0x42c   :  { %v811_v40 = vmul.f32 1.442695, %v799_v39 }
 0x42e   :  { %2363 = vpow2.f32 %v811_v40 }
 0x43b   :  { %v2644_v41 = vpop.eup %2363 }
 0x43c   :  { %v831_v42 = vsel %vm149_vm2, %v2644_v41, 0.0 }
 0x43d   :  { %832 = vadd.xlane.f32.xlu1 %v831_v42 }
 0x444   :  { %v830_v43 = vpop.xlane.xlu0 %829 }
 0x445   :  { %2365 = vrcp.f32 %v830_v43 }
 0x448   :  { %v1321_v44 = vpop.permute.xlu0 %1320 }
 0x449   :  { %2281 = vmatpush3.msra.mxu0 %v1321_v44 }
 0x44a   :  { %2290 = vmatprep.subr.mxu0 %v2401_v10 }
 0x44c   :  { %v1091_v45 = vpop.permute.xlu0 %1090 }
 0x44d   :  { %2266 = vmatpush3.msra.mxu1 %v1091_v45 }
 0x44e   :  { %1777 = vrot.lane.b32.xlu1 %v2618_v31, %s2412_s13  ;;  %2275 = vmatprep.subr.mxu1 %v2401_v10 }
 0x452   :  { %v2366_v46 = vpop.eup %2365 }
 0x453   :  { %v850_v47 = vmul.f32 %v2366_v46, %v2599_v0 }
 0x455   :  { %2283 = vmatmul.mubr.msk.f32.vlgmr.msra.gmra.mxu0 %vm149_vm2, %v850_v47 }
 0x456   :  { %2292 = vmatprep.mubr.msk.f32.mxu0 %vm2402_vm1, %v2401_v10 }
 0x489   :  { %v836_v58 = vpop.xlane.xlu0 %835 }
 0x48a   :  { %2367 = vrcp.f32 %v836_v58 }
 0x48d   :  { %v1556_v61 = vpop.permute.xlu0 %1555 }
 0x497   :  { %v2368_v59 = vpop.eup %2367 }
 0x498   :  { %v854_v63 = vmul.f32 %v2368_v59, %v2607_v24 }
 0x4c6   :  { %v833_v24 = vpop.xlane.xlu1 %832 }
 0x4d3   :  { %v689_v48 = vpop.f32.mrf.mxu0 }
 0x4d4   :  { %v789_v49 = vsel %vm149_vm2, %v689_v48, -inf }
 0x4d5   :  { %v2244_v50 = vpop.f32.mrf.mxu0  ;;  %790 = vmax.xlane.f32.xlu0 %v789_v49 }
 0x4d9   :  { %793 = vmax.xlane.f32.xlu0 %v792_v51 }
 0x4dc   :  { %v932_v52 = vpop.f32.mrf.mxu0 }
 0x4dd   :  { %2268 = vmatmul.mubr.msk.f32.vlgmr.msra.gmra.mxu1 %vm149_vm2, %v932_v52 }
 0x4de   :  { %v2254_v53 = vpop.f32.mrf.mxu0  ;;  %2276 = vmatpush3.msra.mxu1 %v2631_v16  ;;  %2277 = vmatprep.mubr.msk.f32.mxu1 %vm2402_vm1, %v2401_v10 }
 0x4df   :  { %2285 = vmatprep.subr.mxu1 %v2401_v10 }
 0x4e0   :  { %v1085_v54 = vpop.f32.mrf.mxu0 }
 0x4e2   :  { %v2264_v55 = vpop.f32.mrf.mxu0 }
 0x4e4   :  { %v1238_v56 = vpop.f32.mrf.mxu0 }
 0x4e5   :  { %2278 = vmatmul.mubr.msk.f32.vlgmr.msra.gmra.mxu1 %vm149_vm2, %v1238_v56 }
 0x4e6   :  { %v2274_v57 = vpop.f32.mrf.mxu0  ;;  %2286 = vmatpush3.msra.mxu1 %v2639_v37  ;;  %2287 = vmatprep.mubr.msk.f32.mxu1 %vm2402_vm1, %v2401_v10 }
 0x4e7   :  { %2295 = vmatprep.subr.mxu1 %v2401_v10 }
 0x515   :  { %v1392_v60 = vpop.f32.mrf.mxu0 }
 0x516   :  { %2288 = vmatmul.mubr.msk.f32.vlgmr.msra.gmra.mxu1 %vm149_vm2, %v1392_v60 }
 0x517   :  { %2296 = vmatpush3.msra.mxu1 %v1556_v61  ;;  %v2284_v62 = vpop.f32.mrf.mxu0  ;;  %2297 = vmatprep.mubr.msk.f32.mxu1 %vm2402_vm1, %v2401_v10 }
 0x518   :  { %2305 = vmatprep.subr.mxu1 %v2401_v10 }
 0x51a   :  { %2298 = vmatmul.mubr.msk.f32.vlgmr.msra.gmra.mxu1 %vm149_vm2, %v854_v63 }
 0x51b   :  { %2306 = vmatpush3.msra.mxu1 %v1091_v45  ;;  %2307 = vmatprep.mubr.msk.f32.mxu1 %vm2402_vm1, %v2401_v10 }
 0x51c   :  { %2315 = vmatprep.subr.mxu1 %v2401_v10 }
 0x55e   :  { %v791_v2 = vpop.xlane.xlu0 %790 }
 0x55f   :  { %v801_v5 = vsub.f32 %v689_v48, %v791_v2 }
 0x561   :  { %v815_v6 = vmul.f32 1.442695, %v801_v5 }
 0x562   :  { %v794_v7 = vpop.xlane.xlu0 %793 }
 0x563   :  { %2369 = vpow2.f32 %v815_v6  ;;  %v802_v8 = vsub.f32 %v2609_v25, %v794_v7  ;;  %v1778_v25 = vpop.permute.xlu1 %1777 }
 0x565   :  { %v817_v9 = vmul.f32 1.442695, %v802_v8 }
 0x567   :  { %2371 = vpow2.f32 %v817_v9 }
 0x568   :  { %2373 = vrcp.f32 %v833_v24 }
 0x570   :  { %v2370_v12 = vpop.eup %2369 }
 0x571   :  { %v837_v14 = vsel %vm149_vm2, %v2370_v12, 0.0 }
 0x572   :  { %838 = vadd.xlane.f32.xlu0 %v837_v14 }
 0x574   :  { %v2372_v15 = vpop.eup %2371 }
 0x575   :  { %v840_v1 = vsel %vm149_vm2, %v2372_v15, 0.0  ;;  %v2374_v27 = vpop.eup %2373 }
 0x576   :  { %841 = vadd.xlane.f32.xlu1 %v840_v1 }
 0x587   :  { %1927 = vrot.lane.b32.xlu1 %v2618_v31, %s2414_s15 }
 0x588   :  { %1479 = vrot.lane.b32.xlu0 %v2618_v31, %s2411_s12 }
 0x58c   :  { %1474 = vrot.lane.b32.xlu0 %v2499_v11, %s2413_s14  ;;  %v852_v11 = vmul.f32 %v2374_v27, %v2644_v41 }
 0x59d   :  { %v1162_v17 = vpop.f32.mrf.mxu1 }
 0x59e   :  { %v1163_v18 = vadd.f32 %v1162_v17, %v1085_v54 }
 0x59f   :  { %v2269_v0 = vpop.f32.mrf.mxu1 }
 0x5a5   :  { %v1315_v3 = vpop.f32.mrf.mxu1 }
 0x5a6   :  { %v1319_v13 = vadd.f32 %v1315_v3, %v1163_v18 }
 0x5a7   :  { %v2279_v19 = vpop.f32.mrf.mxu1 }
 0x5d6   :  { %v1469_v20 = vpop.f32.mrf.mxu1 }
 0x5d7   :  { %v1473_v4 = vadd.f32 %v1469_v20, %v1319_v13 }
 0x5d8   :  { %v2289_v21 = vpop.f32.mrf.mxu1 }
 0x5da   :  { %v1627_v22 = vpop.f32.mrf.mxu1 }
 0x5dc   :  { %v2299_v23 = vpop.f32.mrf.mxu1 }
 0x5fb   :  { %v839_v26 = vpop.xlane.xlu0 %838 }
 0x5fc   :  { %2375 = vrcp.f32 %v839_v26 }
 0x5ff   :  { %v842_v28 = vpop.xlane.xlu1 %841  ;;  %v1480_v29 = vpop.permute.xlu0 %1479 }
 0x600   :  { %2377 = vrcp.f32 %v842_v28  ;;  %2291 = vmatpush3.msra.mxu0 %v1480_v29 }
 0x601   :  { %2293 = vmatmul.mubr.msk.f32.vlgmr.msra.gmra.mxu0 %vm149_vm2, %v852_v11  ;;  %2300 = vmatprep.subr.mxu0 %v2401_v10 }
 0x602   :  { %2301 = vmatpush3.msra.mxu0 %v2625_v34  ;;  %2302 = vmatprep.mubr.msk.f32.mxu0 %vm2402_vm1, %v2401_v10 }
 0x603   :  { %v1475_v30 = vpop.permute.xlu0 %1474  ;;  %2310 = vmatprep.subr.mxu0 %v2401_v10  ;;  %v1928_v34 = vpop.permute.xlu1 %1927 }
 0x604   :  { %v1477_v31 = vadd.f32 %v1475_v30, %v1473_v4 }
 0x605   :  { %2303 = vmatmul.mubr.msk.f32.vlgmr.msra.gmra.mxu0 %vm149_vm2, %v1627_v22 }
 0x606   :  { %2078 = vst.msk [vmem:[#allocation2] sm:$0xff] %vm32_vm0, %v1477_v31  ;;  %2311 = vmatpush3.msra.mxu0 %v1778_v25  ;;  %2312 = vmatprep.mubr.msk.f32.mxu0 %vm2402_vm1, %v2401_v10 }
 0x607   :  { %2320 = vmatprep.subr.mxu0 %v2401_v10 }
 0x609   :  { %v2376_v32 = vpop.eup %2375 }
 0x60a   :  { %v856_v33 = vmul.f32 %v2376_v32, %v2370_v12 }
 0x60c   :  { %2313 = vmatmul.mubr.msk.f32.vlgmr.msra.gmra.mxu0 %vm149_vm2, %v856_v33 }
 0x60d   :  { %v2378_v35 = vpop.eup %2377  ;;  %2321 = vmatpush3.msra.mxu0 %v1928_v34  ;;  %2322 = vmatprep.mubr.msk.f32.mxu0 %vm2402_vm1, %v2401_v10 }
 0x60e   :  { %v858_v36 = vmul.f32 %v2378_v35, %v2372_v15 }
 0x610   :  { %2323 = vmatmul.mubr.msk.f32.vlgmr.msra.gmra.mxu0 %vm149_vm2, %v858_v36 }
 0x6c1   :  { %v1551_v38 = vpop.f32.mrf.mxu0 }
 0x6c2   :  { %2308 = vmatmul.mubr.msk.f32.vlgmr.msra.gmra.mxu1 %vm149_vm2, %v1551_v38 }
 0x6c3   :  { %2316 = vmatpush3.msra.mxu1 %v2631_v16  ;;  %v2294_v39 = vpop.f32.mrf.mxu0  ;;  %2317 = vmatprep.mubr.msk.f32.mxu1 %vm2402_vm1, %v2401_v10 }
 0x6c4   :  { %2325 = vmatprep.subr.mxu1 %v2401_v10 }
 0x6c5   :  { %v1700_v40 = vpop.f32.mrf.mxu0 }
 0x6c7   :  { %v2304_v41 = vpop.f32.mrf.mxu0 }
 0x6cc   :  { %v1849_v42 = vpop.f32.mrf.mxu0 }
 0x6cd   :  { %2318 = vmatmul.mubr.msk.f32.vlgmr.msra.gmra.mxu1 %vm149_vm2, %v1849_v42 }
 0x6ce   :  { %2326 = vmatpush3.msra.mxu1 %v2639_v37  ;;  %v2314_v43 = vpop.f32.mrf.mxu0  ;;  %2327 = vmatprep.mubr.msk.f32.mxu1 %vm2402_vm1, %v2401_v10 }
 0x6d0   :  { %v1999_v44 = vpop.f32.mrf.mxu0 }
 0x6d1   :  { %2328 = vmatmul.mubr.msk.f32.vlgmr.msra.gmra.mxu1 %vm149_vm2, %v1999_v44 }
 0x6d2   :  { %v2324_v16 = vpop.f32.mrf.mxu0 }
 0x782   :  { %v1773_v45 = vpop.f32.mrf.mxu1 }
 0x783   :  { %v1774_v48 = vadd.f32 %v1773_v45, %v1700_v40 }
 0x784   :  { %v2309_v46 = vpop.f32.mrf.mxu1 }
 0x78d   :  { %v1922_v47 = vpop.f32.mrf.mxu1 }
 0x78e   :  { %v1926_v50 = vadd.f32 %v1922_v47, %v1774_v48 }
 0x78f   :  { %v2319_v49 = vpop.f32.mrf.mxu1 }
 0x791   :  { %v2072_v51 = vpop.f32.mrf.mxu1 }
 0x792   :  { %v2076_v52 = vadd.f32 %v2072_v51, %v1926_v50 }
 0x793   :  { %v2329_v53 = vpop.f32.mrf.mxu1 }
 0x794   :  { %v2077_v37 = vadd.f32 %v2076_v52, %v1475_v30 }
 0x796   :  { %2079 = vst.msk [vmem:[#allocation2 + $0x8] sm:$0xff] %vm32_vm0, %v2077_v37 }
 0x797   :  { %2390 = shalt.err (!%p2387_p4)
}
 0x798   :  { %s2416_s19 = smov 128   ;;  %s2417_s20 = smov 8  }
 0x799   :  { %2091 = dma.vmem_to_hbm [thread:$0]  %s2086_s17, 256, %s2720_s3, [#allocation3], %s2416_s19, %s2416_s19, %s2417_s20  }
 0x79a   :  { %2399 = dma.done.wait [#allocation3], 256  }
 0x79b   :  { %2400 = vsyncadd [#allocation3], 4294967040 }
 0x79c   :  { %2095 = vsyncpa [#allocation3], 1 }

</bundles_post_ra>
